<compile_context>
chip_gen: v7x
topology: tpu7x:2x2x1
jax: 0.10.0
libtpu: 0.0.40
codegen_flags: <defaults>
</compile_context>

<pallas_src>
import jax
import jax.numpy as jnp
from jax.experimental import pallas as pl
from jax.experimental.pallas import tpu as pltpu

LAMBDA1 = 1.0
LAMBDA2 = 1.0
EPS = 1e-20

_NUM_CORE_SPLITS = 2  # leading "parallel" axis; harmless on single-TC v5e/v6e.


def _round_up(x, m):
    return (x + m - 1) // m * m


def _cdiv(a, b):
    return -(-a // b)


def _vmem_budget_bytes():
    """Scoped-VMEM budget derived from this chip's physical VMEM."""
    try:
        cap = int(getattr(pltpu.get_tpu_info(), "vmem_capacity_bytes", 0)) or (64 << 20)
    except Exception:
        cap = 64 << 20
    # Use at most half of physical VMEM (v7x: ~32 MiB, v5e/v6e: 64 MiB), capped.
    return min(cap // 2, 64 << 20)


def semantic_loss(pred_vec, gt_vec, *, max_tile_elems=None):
    """pred_vec, gt_vec: (B, D) float arrays (f32 or bf16). Returns scalar f32 loss."""
    assert pred_vec.shape == gt_vec.shape and pred_vec.ndim == 2
    B, D = pred_vec.shape
    n_elems = B * D  # GLOBAL element count for both means.

    vmem_budget = _vmem_budget_bytes()
    if max_tile_elems is None:
        # 2 inputs x 2 pipeline buffers per tile (+ accumulator / output headroom).
        max_tile_elems = max(8 * 128, (vmem_budget // 6) // 4)

    # --- Feature (lane) tiling: full D if it fits at tb=8, else multiples of 128. ---
    if D <= max(128, max_tile_elems // 8):
        tD, dsteps = D, 1
    else:
        tD = max(128, (max_tile_elems // 8) // 128 * 128)
        dsteps = _cdiv(D, tD)

    # --- Row (sublane) tiling: biggest multiple of 8 that fits the budget. ---
    tb = min(_round_up(B, 8), max(8, (max_tile_elems // tD) // 8 * 8))
    n_row_tiles = _cdiv(B, tb)
    num_splits = _NUM_CORE_SPLITS if n_row_tiles >= _NUM_CORE_SPLITS else 1
    rsteps = _cdiv(n_row_tiles, num_splits)

    need_row_mask = (num_splits * rsteps * tb) != B
    need_col_mask = (dsteps * tD) != D
    last_row_tile = n_row_tiles - 1

    def kernel(pred_ref, gt_ref, out_ref, acc_ref):
        i = pl.program_id(1)  # row-tile step within this split
        j = pl.program_id(2)  # feature-tile step

        @pl.when((i == 0) & (j == 0))
        def _():
            acc_ref[...] = jnp.zeros_like(acc_ref)

        pred = pred_ref[...].astype(jnp.float32)
        gt = gt_ref[...].astype(jnp.float32)

        # Fused per-element loss, ONE log (EUP) per element:
        #   |gt - pred| + (gt+eps) * log((gt+eps) / (pred+eps))
        tgt = gt + EPS
        elem = (LAMBDA1 * jnp.abs(gt - pred)
                + LAMBDA2 * tgt * jnp.log(tgt / (pred + EPS)))

        # Mask rows / columns outside the logical (B, D) extent (jnp.where is a
        # select, so NaN/Inf from garbage padding data never leaks through).
        valid = None
        if need_row_mask:
            row_off = (pl.program_id(0) * rsteps + i) * tb
            rows = jax.lax.broadcasted_iota(jnp.int32, (tb, tD), 0) + row_off
            valid = rows < B
        if need_col_mask:
            cols = jax.lax.broadcasted_iota(jnp.int32, (tb, tD), 1) + j * tD
            cmask = cols < D
            valid = cmask if valid is None else (valid & cmask)
        if valid is not None:
            elem = jnp.where(valid, elem, 0.0)

        # Steady state: only a sublane (axis 0) reduce into the per-lane accumulator.
        acc_ref[...] += jnp.sum(elem, axis=0, keepdims=True)

        @pl.when((i == pl.num_programs(1) - 1) & (j == pl.num_programs(2) - 1))
        def _():
            total = jnp.sum(acc_ref[...], keepdims=True)  # single lane reduce, epilogue only
            out_ref[...] = jnp.broadcast_to(total, out_ref.shape)

    def row_block(s, i, j):
        # Clamp so steps past the last row tile re-read (and fully mask) it instead of
        # issuing a fully out-of-bounds DMA.
        return (jnp.minimum(s * rsteps + i, last_row_tile), j)

    out = pl.pallas_call(
        kernel,
        out_shape=jax.ShapeDtypeStruct((1, num_splits * 128), jnp.float32),
        grid=(num_splits, rsteps, dsteps),
        in_specs=[
            pl.BlockSpec((tb, tD), row_block),
            pl.BlockSpec((tb, tD), row_block),
        ],
        out_specs=pl.BlockSpec((1, 128), lambda s, i, j: (0, s)),
        scratch_shapes=[pltpu.VMEM((1, tD), jnp.float32)],
        compiler_params=pltpu.CompilerParams(
            # TODO(synk): on v7x switch the leading axis to pltpu.CORE_PARALLEL so each
            # TensorCore owns half the row tiles (its own ~3.2 TB/s HBM path).
            dimension_semantics=("parallel", "arbitrary", "arbitrary"),
            vmem_limit_bytes=vmem_budget,
        ),
    )(pred_vec, gt_vec)

    partials = out[0, ::128]  # one replicated scalar per split
    return jnp.sum(partials) / jnp.float32(n_elems)


def semantic_loss_ref(pred_vec, gt_vec):
    """Pure-JAX reference mirroring the PyTorch module."""
    pred = pred_vec.astype(jnp.float32)
    gt = gt_vec.astype(jnp.float32)
    margin_loss = jnp.mean(jnp.abs(gt - pred))
    tgt = gt + EPS
    ce_loss = jnp.mean(tgt * (jnp.log(tgt) - jnp.log(pred + EPS)))
    return LAMBDA1 * margin_loss + LAMBDA2 * ce_loss


if __name__ == "__main__":
    key = jax.random.PRNGKey(0)
    ks = jax.random.split(key, 6)

    # 1) Small module-like case: batch=2 semantic vectors, hidden=32 (single tile).
    p1 = jax.nn.softmax(jax.random.normal(ks[0], (2, 32), jnp.float32), axis=-1)
    g1 = jax.nn.softmax(jax.random.normal(ks[1], (2, 32), jnp.float32), axis=-1)
    l1 = jax.block_until_ready(semantic_loss(p1, g1))
    r1 = jax.block_until_ready(semantic_loss_ref(p1, g1))
    assert jnp.allclose(l1, r1, rtol=1e-5, atol=1e-6), (l1, r1)

    # 2) Ragged batch + feature tiling + 2-way split (tiny budget forces 8x128 tiles,
    #    row masking, clamped trailing tiles and multiple reduction steps).
    p2 = jax.nn.softmax(jax.random.normal(ks[2], (40, 256), jnp.float32), axis=-1)
    g2 = jax.nn.softmax(jax.random.normal(ks[3], (40, 256), jnp.float32), axis=-1)
    l2 = jax.block_until_ready(semantic_loss(p2, g2, max_tile_elems=1024))
    r2 = jax.block_until_ready(semantic_loss_ref(p2, g2))
    assert jnp.allclose(l2, r2, rtol=1e-5, atol=1e-6), (l2, r2)

    # 3) Ragged batch AND ragged feature dim (exercises both row and column masks).
    p3 = jax.nn.softmax(jax.random.normal(ks[4], (13, 300), jnp.float32), axis=-1)
    g3 = jax.nn.softmax(jax.random.normal(ks[5], (13, 300), jnp.float32), axis=-1)
    l3 = jax.block_until_ready(semantic_loss(p3, g3, max_tile_elems=1024))
    r3 = jax.block_until_ready(semantic_loss_ref(p3, g3))
    assert jnp.allclose(l3, r3, rtol=1e-5, atol=1e-6), (l3, r3)

    print("KERNEL_OK")
</pallas_src>

<mosaic_0001>
module attributes {stable_mosaic.version = 11 : i64} {
  func.func @kernel(%arg0: i32, %arg1: i32, %arg2: i32, %arg3: memref<8x32xf32, #tpu.memory_space<vmem>>, %arg4: memref<8x32xf32, #tpu.memory_space<vmem>>, %arg5: memref<1x128xf32, #tpu.memory_space<vmem>>, %arg6: memref<1x32xf32, #tpu.memory_space<vmem>>) attributes {dimension_semantics = [#tpu.dimension_semantics<parallel>, #tpu.dimension_semantics<arbitrary>, #tpu.dimension_semantics<arbitrary>], iteration_bounds = array<i64: 1, 1, 1>, scalar_prefetch = 0 : i64, scratch_operands = 1 : i64, tpu.core_type = #tpu.core_type<tc>, window_params = [{transform_indices = @transform_0, window_bounds = array<i64: 8, 32>}, {transform_indices = @transform_1, window_bounds = array<i64: 8, 32>}, {transform_indices = @transform_2, window_bounds = array<i64: 1, 128>}]} {
    %c0_i32 = arith.constant 0 : i32
    %0 = arith.cmpi eq, %arg1, %c0_i32 : i32
    %c0_i32_0 = arith.constant 0 : i32
    %1 = arith.cmpi eq, %arg2, %c0_i32_0 : i32
    %2 = arith.andi %0, %1 : i1
    %3 = arith.extui %2 : i1 to i32
    %c0_i32_1 = arith.constant 0 : i32
    %4 = arith.cmpi ne, %3, %c0_i32_1 : i32
    scf.if %4 {
      %cst_17 = arith.constant 0.000000e+00 : f32
      %41 = vector.broadcast %cst_17 : f32 to vector<1x32xf32>
      %c0_18 = arith.constant 0 : index
      %c0_19 = arith.constant 0 : index
      %42 = vector.load %arg6[%c0_18, %c0_19] : memref<1x32xf32, #tpu.memory_space<vmem>>, vector<1x32xf32>
      tpu.vector_store %arg6[%c0_18, %c0_19], %41 {strides = array<i32>} : memref<1x32xf32, #tpu.memory_space<vmem>>, vector<1x32xf32>,
    } else {
    }
    %c0 = arith.constant 0 : index
    %c0_2 = arith.constant 0 : index
    %5 = vector.load %arg3[%c0, %c0_2] : memref<8x32xf32, #tpu.memory_space<vmem>>, vector<8x32xf32>
    %c0_3 = arith.constant 0 : index
    %c0_4 = arith.constant 0 : index
    %6 = vector.load %arg4[%c0_3, %c0_4] : memref<8x32xf32, #tpu.memory_space<vmem>>, vector<8x32xf32>
    %cst = arith.constant 9.99999968E-21 : f32
    %7 = vector.broadcast %cst : f32 to vector<8x32xf32>
    %8 = arith.addf %6, %7 : vector<8x32xf32>
    %9 = arith.subf %6, %5 : vector<8x32xf32>
    %10 = math.absf %9 : vector<8x32xf32>
    %cst_5 = arith.constant 1.000000e+00 : f32
    %11 = vector.broadcast %cst_5 : f32 to vector<8x32xf32>
    %12 = arith.mulf %11, %10 : vector<8x32xf32>
    %cst_6 = arith.constant 1.000000e+00 : f32
    %13 = vector.broadcast %cst_6 : f32 to vector<8x32xf32>
    %14 = arith.mulf %13, %8 : vector<8x32xf32>
    %cst_7 = arith.constant 9.99999968E-21 : f32
    %15 = vector.broadcast %cst_7 : f32 to vector<8x32xf32>
    %16 = arith.addf %5, %15 : vector<8x32xf32>
    %17 = arith.divf %8, %16 : vector<8x32xf32>
    %18 = math.log %17 : vector<8x32xf32>
    %19 = arith.mulf %14, %18 : vector<8x32xf32>
    %20 = arith.addf %12, %19 : vector<8x32xf32>
    %c1_i32 = arith.constant 1 : i32
    %21 = arith.muli %arg0, %c1_i32 : i32
    %22 = arith.addi %21, %arg1 : i32
    %c8_i32 = arith.constant 8 : i32
    %23 = arith.muli %22, %c8_i32 : i32
    %24 = tpu.iota {dimensions = array<i32: 0>} : vector<8x32xi32>
    %25 = vector.broadcast %23 : i32 to vector<8x32xi32>
    %26 = arith.addi %24, %25 : vector<8x32xi32>
    %c2_i32 = arith.constant 2 : i32
    %27 = vector.broadcast %c2_i32 : i32 to vector<8x32xi32>
    %28 = arith.cmpi slt, %26, %27 : vector<8x32xi32>
    %cst_8 = arith.constant 0.000000e+00 : f32
    %29 = vector.broadcast %cst_8 : f32 to vector<8x32xf32>
    %30 = arith.select %28, %20, %29 : vector<8x32xi1>, vector<8x32xf32>
    %c0_9 = arith.constant 0 : index
    %c0_10 = arith.constant 0 : index
    %31 = vector.load %arg6[%c0_9, %c0_10] : memref<1x32xf32, #tpu.memory_space<vmem>>, vector<1x32xf32>
    %cst_11 = arith.constant dense<0.000000e+00> : vector<32xf32>
    %32 = vector.multi_reduction <add>, %30, %cst_11 [0] : vector<8x32xf32> to vector<32xf32>
    %33 = vector.shape_cast %32 : vector<32xf32> to vector<1x32xf32>
    %34 = arith.addf %31, %33 : vector<1x32xf32>
    %c0_12 = arith.constant 0 : index
    %c0_13 = arith.constant 0 : index
    %35 = vector.load %arg6[%c0_12, %c0_13] : memref<1x32xf32, #tpu.memory_space<vmem>>, vector<1x32xf32>
    tpu.vector_store %arg6[%c0_12, %c0_13], %34 {strides = array<i32>} : memref<1x32xf32, #tpu.memory_space<vmem>>, vector<1x32xf32>,
    %c0_i32_14 = arith.constant 0 : i32
    %36 = arith.cmpi eq, %arg1, %c0_i32_14 : i32
    %c0_i32_15 = arith.constant 0 : i32
    %37 = arith.cmpi eq, %arg2, %c0_i32_15 : i32
    %38 = arith.andi %36, %37 : i1
    %39 = arith.extui %38 : i1 to i32
    %c0_i32_16 = arith.constant 0 : i32
    %40 = arith.cmpi ne, %39, %c0_i32_16 : i32
    scf.if %40 {
      %c0_17 = arith.constant 0 : index
      %c0_18 = arith.constant 0 : index
      %41 = vector.load %arg6[%c0_17, %c0_18] : memref<1x32xf32, #tpu.memory_space<vmem>>, vector<1x32xf32>
      %42 = vector.shape_cast %41 : vector<1x32xf32> to vector<1x1x32xf32>
      %cst_19 = arith.constant dense<0.000000e+00> : vector<1xf32>
      %43 = vector.multi_reduction <add>, %42, %cst_19 [1, 2] : vector<1x1x32xf32> to vector<1xf32>
      %44 = vector.shape_cast %43 : vector<1xf32> to vector<1x1x1xf32>
      %45 = vector.extract %44[0, 0, 0] : f32 from vector<1x1x1xf32>
      %46 = vector.broadcast %45 : f32 to vector<1x1xf32>
      %47 = vector.shape_cast %46 : vector<1x1xf32> to vector<1x1xf32>
      %48 = vector.broadcast %47 : vector<1x1xf32> to vector<1x128xf32>
      %c0_20 = arith.constant 0 : index
      %c0_21 = arith.constant 0 : index
      %49 = vector.load %arg5[%c0_20, %c0_21] : memref<1x128xf32, #tpu.memory_space<vmem>>, vector<1x128xf32>
      tpu.vector_store %arg5[%c0_20, %c0_21], %48 {strides = array<i32>} : memref<1x128xf32, #tpu.memory_space<vmem>>, vector<1x128xf32>,
    } else {
    }
    return
  }
  func.func @transform_0(%arg0: i32, %arg1: i32, %arg2: i32) -> (i32, i32) {
    %c1_i32 = arith.constant 1 : i32
    %0 = arith.muli %arg0, %c1_i32 : i32
    %1 = arith.addi %0, %arg1 : i32
    %c0_i32 = arith.constant 0 : i32
    %2 = arith.minsi %1, %c0_i32 : i32
    %c0_i32_0 = arith.constant 0 : i32
    return %2, %arg2 : i32, i32
  }
  func.func @transform_1(%arg0: i32, %arg1: i32, %arg2: i32) -> (i32, i32) {
    %c1_i32 = arith.constant 1 : i32
    %0 = arith.muli %arg0, %c1_i32 : i32
    %1 = arith.addi %0, %arg1 : i32
    %c0_i32 = arith.constant 0 : i32
    %2 = arith.minsi %1, %c0_i32 : i32
    %c0_i32_0 = arith.constant 0 : i32
    return %2, %arg2 : i32, i32
  }
  func.func @transform_2(%arg0: i32, %arg1: i32, %arg2: i32) -> (i32, i32) {
    %c0_i32 = arith.constant 0 : i32
    %c0_i32_0 = arith.constant 0 : i32
    return %c0_i32, %arg0 : i32, i32
  }
}

</mosaic_0001>

<bundles_post_ra>
// kernel: tpu_custom_call.1
= control target key start
LH: loop header
LB: loop body
LE: loop exit
PB: predicated region body
PF: predicated region fallthrough
CT: control target
= control target key end

     0   :  { %7 = vsyncpa [#allocation4], 0  ;;  %s271_s0 = inlined_call_operand.hbm [shape: f32[2,32], index: 0, kind: input, shape index: {}]   ;;  %s272_s1 = inlined_call_operand.vmem [shape: f32[2,32], index: 1, kind: input, shape index: {}]   ;;  %s273_s2 = inlined_call_operand.hbm [shape: f32[1,128], index: 2, kind: output, shape index: {}]  }
   0x1   :  { %8 = vsyncpa [#allocation5], 0 }
   0x2   :  { %19 = vsyncadd [#allocation4], 96  ;;  %s221_s9 = smov [#allocation3]   ;;  %s173_s13 = scalar_lea.hbm %s271_s0, 32 }
   0x3   :  { %s24_s10 = sshll.u32 %s221_s9, 4  ;;  %p174_p0 = scmp.ne.s32.totalorder %s271_s0, %s173_s13  ;;  %s25_s10 = int_to_ptr.vmem [resolvable:$true] %s24_s10 }
   0x4   :  { %p177_p1 = scmp.lt.u32.totalorder %s173_s13, %s271_s0 }
   0x6   :  { %p179_p2 = pnand %p177_p1, %p174_p0 }
   0x8   :  { %182 = shalt.err (!%p179_p2)
}
   0x9   :  { %s183_s18 = scalar_lea.vmem %s25_s10, 32  ;;  %s187_s19 = scalar_lea.vmem %s25_s10, 128 }
   0xa   :  { %p184_p3 = scmp.ne.s32.totalorder %s25_s10, %s183_s18  ;;  %p188_p4 = scmp.lt.s32.totalorder %s25_s10, %s25_s10 }
   0xb   :  { %p189_p5 = scmp.lt.s32.totalorder %s187_s19, %s183_s18 }
   0xd   :  { %p190_p6 = por %p189_p5, %p188_p4 }
   0xf   :  { %p191_p7 = pnand %p190_p6, %p184_p3 }
  0x11   :  { %194 = shalt.err (!%p191_p7)
}
  0x12   :  { %s222_s20 = smov 32   ;;  %s223_s21 = smov 2  }
  0x13   :  { %30 = dma.hbm_to_vmem [thread:$0]  %s271_s0, 32, %s25_s10, [#allocation4], %s222_s20, %s222_s20, %s223_s21  }
  0x14   :  { %217 = dma.done.wait [#allocation4], 128  }
  0x15   :  { %218 = vsyncadd [#allocation4], 4294967168  ;;  %vm90_vm0 = vcmask 253952   ;;  %v224_v0 = vmov 0.0   ;;  %v92_v1 = vld [vmem:[#allocation3] sm:$0xff]  ;;  %v106_v7 = vlaneseq  ;;  %vm113_vm2 = vcmask 261120  }
  0x16   :  { %91 = vst.msk [vmem:[#allocation2] sm:$0x1] %vm90_vm0, %v224_v0  ;;  %v97_v2 = vadd.f32 1e-20, %v92_v1  ;;  %v93_v3 = vld [vmem:[%s272_s1] sm:$0xff]  ;;  %s225_s0 = smov [#allocation6]  }
  0x17   :  { %v94_v4 = vadd.f32 1e-20, %v93_v3  ;;  %v95_v8 = vsub.f32 %v93_v3, %v92_v1  ;;  %v107_v10 = vshrl.u32 %v106_v7, 7  ;;  %s145_s1 = sshll.u32 %s225_s0, 4  ;;  %s146_s1 = int_to_ptr.vmem [resolvable:$true] %s145_s1 }
  0x18   :  { %169 = vrcp.f32 %v97_v2  ;;  %s195_s27 = scalar_lea.vmem %s146_s1, 16  ;;  %s199_s28 = scalar_lea.vmem %s146_s1, 32 }
  0x19   :  { %v96_v11 = vand.u32 2147483647, %v95_v8  ;;  %vm110_vm1 = vcmp.lt.s32.totalorder %v107_v10, 2  ;;  %p196_p8 = scmp.ne.s32.totalorder %s146_s1, %s195_s27  ;;  %p200_p9 = scmp.lt.s32.totalorder %s146_s1, %s146_s1 }
  0x1a   :  { %p201_p10 = scmp.lt.s32.totalorder %s199_s28, %s195_s27 }
  0x1c   :  { %p202_p11 = por %p201_p10, %p200_p9 }
  0x1d   :  { %v112_v22 = vld [vmem:[#allocation2] sm:$0x1] }
  0x1e   :  { %p203_p12 = pnand %p202_p11, %p196_p8 }
  0x22   :  { %v170_v5 = vpop.eup %169 }
  0x23   :  { %v99_v6 = vmul.f32 %v170_v5, %v94_v4 }
  0x25   :  { %171 = vlog2.f32 %v99_v6 }
  0x2f   :  { %v172_v9 = vpop.eup %171 }
  0x30   :  { %v101_v12 = vmul.f32 0.6931472, %v172_v9 }
  0x32   :  { %v102_v13 = vmul.f32 %v101_v12, %v94_v4 }
  0x34   :  { %v103_v14 = vadd.f32 %v102_v13, %v96_v11 }
  0x36   :  { %v111_v15 = vsel %vm110_vm1, %v103_v14, 0.0 }
  0x37   :  { %v114_v16 = vsel %vm113_vm2, %v111_v15, 0.0 }
  0x38   :  { %v115_v17 = vrot.slane %v114_v16, 4 }
  0x3a   :  { %v116_v18 = vadd.f32 %v115_v17, %v114_v16 }
  0x3c   :  { %v117_v19 = vrot.slane %v116_v18, 2 }
  0x3e   :  { %v118_v20 = vadd.f32 %v117_v19, %v116_v18 }
  0x40   :  { %v119_v21 = vrot.slane %v118_v20, 1 }
  0x42   :  { %v120_v23 = vadd.f32 %v119_v21, %v118_v20 }
  0x44   :  { %v121_v24 = vadd.f32 %v120_v23, %v112_v22 }
  0x46   :  { %123 = vst.msk [vmem:[#allocation2] sm:$0x1] %vm90_vm0, %v121_v24 }
  0x4d   :  { %v126_v25 = vld [vmem:[#allocation2] sm:$0x1] }
  0x4e   :  { %v127_v26 = vsel %vm90_vm0, %v126_v25, 0.0 }
  0x4f   :  { %128 = vadd.xlane.f32.xlu0 %v127_v26 }
  0xdc   :  { %v129_v27 = vpop.xlane.xlu0 %128 }
  0xdd   :  { %v130_v28 = vrot.slane %v129_v27, 4 }
  0xdf   :  { %v131_v29 = vadd.f32 %v130_v28, %v129_v27 }
  0xe1   :  { %v132_v30 = vrot.slane %v131_v29, 2 }
  0xe3   :  { %v133_v31 = vadd.f32 %v132_v30, %v131_v29 }
  0xe5   :  { %v134_v32 = vrot.slane %v133_v31, 1 }
  0xe7   :  { %v135_v33 = vadd.f32 %v134_v32, %v133_v31 }
  0xe9   :  { %162 = vpush %v135_v33 }
 0x11a   :  { %s163_s26 = spop %162 }
 0x11b   :  { %v137_v34 = vstv %s163_s26 }
 0x11c   :  { %138 = vst [vmem:[#allocation6] sm:$0x1] %v137_v34 }
 0x11d   :  { %206 = shalt.err (!%p203_p12)
}
 0x11e   :  { %s207_s3 = scalar_lea.hbm %s273_s2, 16 }
 0x11f   :  { %p208_p13 = scmp.ne.s32.totalorder %s273_s2, %s207_s3  ;;  %p211_p0 = scmp.lt.u32.totalorder %s207_s3, %s273_s2 }
 0x121   :  { %p213_p1 = pnand %p211_p0, %p208_p13 }
 0x123   :  { %216 = shalt.err (!%p213_p1)
}
 0x124   :  { %148 = dma.vmem_to_hbm [thread:$0]  %s146_s1, 16, %s273_s2, [#allocation5]  }
 0x125   :  { %219 = dma.done.wait [#allocation5], 16  }
 0x126   :  { %220 = vsyncadd [#allocation5], 4294967280 }
 0x127   :  { %152 = vsyncpa [#allocation4], 1 }
 0x128   :  { %153 = vsyncpa [#allocation5], 1 }

</bundles_post_ra>
